<compile_context>
chip_gen: v5e
topology: v5e:2x2
jax: 0.10.0
libtpu: 0.0.40
codegen_flags: <defaults>
</compile_context>

<pallas_src>
import functools

import jax
import jax.numpy as jnp
from jax.experimental import pallas as pl
from jax.experimental.pallas import tpu as pltpu

LANE = 128
IN_FEATURES = 28 * 28     # 784
OUT_FEATURES = 10


def _round_up(x, m):
    return (x + m - 1) // m * m


def mlp_kernel(x_ref, w1_ref, b1_ref, w2_ref, b2_ref, w3_ref, b3_ref, o_ref):
    # Cast the streamed x tile to bf16 in-kernel (MXU-native operand); the DMA
    # carried raw f32 straight from HBM, with no separate pad/convert pass.
    x = x_ref[...].astype(jnp.bfloat16)
    # Layer 1: (TB, 784) bf16 @ (784, Hp) bf16 -> f32 acc, bias add, ReLU.
    h1 = jnp.dot(x, w1_ref[...], preferred_element_type=jnp.float32)
    h1 = jnp.maximum(h1 + b1_ref[...], 0.0)
    # Layer 2: (TB, Hp) @ (Hp, Hp) -> f32 acc, bias add, ReLU.
    h2 = jnp.dot(h1.astype(w2_ref.dtype), w2_ref[...],
                 preferred_element_type=jnp.float32)
    h2 = jnp.maximum(h2 + b2_ref[...], 0.0)
    # Layer 3: (TB, Hp) @ (Hp, Np) -> f32 acc, bias add (no activation).
    out = jnp.dot(h2.astype(w3_ref.dtype), w3_ref[...],
                  preferred_element_type=jnp.float32)
    o_ref[...] = (out + b3_ref[...]).astype(o_ref.dtype)


def _resident_spec(arr, single_buffer):
    """Whole-array block with constant index_map -> VMEM-resident across the grid.

    For large weights, request a single buffer (the block index never changes, so
    the default double buffer is pure VMEM waste -- relevant on v7x's 64 MiB)."""
    nd = arr.ndim
    index_map = lambda i: (0,) * nd
    if single_buffer:
        try:
            return pl.BlockSpec(arr.shape, index_map, pipeline_mode=pl.Buffered(1))
        except (TypeError, AttributeError):   # older JAX without pipeline_mode
            pass
    return pl.BlockSpec(arr.shape, index_map)


@functools.partial(jax.jit, static_argnames=("tile_b",))
def mlp_forward(x, w1, b1, w2, b2, w3, b3, *, tile_b=1024):
    """x: (..., 28, 28) or (B, 784) float; w_i stored as (in, out); b_i as (1, out).
    Returns (B, 10) f32 logits (matches PyTorch MLP.forward)."""
    x = x.reshape(-1, IN_FEATURES)            # x.view(-1, 784)
    B = x.shape[0]
    H = w1.shape[1]

    H_pad = _round_up(H, LANE)
    N_pad = _round_up(OUT_FEATURES, LANE)     # 10 -> 128 (lane-dense output)

    # Batch tile: multiple of 16, <= tile_b, and <= ~B/2 so the grid has >= 2
    # steps for the v7x megacore whenever the batch is big enough.
    half = _round_up(pl.cdiv(B, 2), 16)
    eff_tile = _round_up(max(16, min(tile_b, half)), 16)
    grid = pl.cdiv(B, eff_tile)               # ragged last block handled by Pallas

    # One-time zero padding of the (tiny) weights/biases; zero columns/rows plus
    # zero bias keep the math exact.  bf16 weights for the MXU, f32 biases for
    # the f32 accumulator add.
    w1_p = jnp.pad(w1, ((0, 0), (0, H_pad - H))).astype(jnp.bfloat16)
    b1_p = jnp.pad(b1, ((0, 0), (0, H_pad - H))).astype(jnp.float32)
    w2_p = jnp.pad(w2, ((0, H_pad - H), (0, H_pad - H))).astype(jnp.bfloat16)
    b2_p = jnp.pad(b2, ((0, 0), (0, H_pad - H))).astype(jnp.float32)
    w3_p = jnp.pad(w3, ((0, H_pad - H), (0, N_pad - OUT_FEATURES))).astype(jnp.bfloat16)
    b3_p = jnp.pad(b3, ((0, 0), (0, N_pad - OUT_FEATURES))).astype(jnp.float32)

    resident = [w1_p, b1_p, w2_p, b2_p, w3_p, b3_p]
    resident_bytes = sum(int(a.size) * a.dtype.itemsize for a in resident)
    single_buf = resident_bytes > (4 << 20)   # only worth it when weights are big

    # Advisory cost estimate (HBM-bound kernel: bytes dominate).
    flops = 2 * B * (IN_FEATURES * H_pad + H_pad * H_pad + H_pad * N_pad)
    bytes_accessed = B * (IN_FEATURES * x.dtype.itemsize + N_pad * 4) + resident_bytes

    out_p = pl.pallas_call(
        mlp_kernel,
        out_shape=jax.ShapeDtypeStruct((B, N_pad), jnp.float32),
        grid_spec=pltpu.PrefetchScalarGridSpec(
            num_scalar_prefetch=0,
            grid=(grid,),
            in_specs=[
                # x tile streamed & double-buffered by the BlockSpec pipeline;
                # last dim 784 == full array dim, so no K padding is needed.
                pl.BlockSpec((eff_tile, IN_FEATURES), lambda i: (i, 0)),
            ] + [_resident_spec(a, single_buf) for a in resident],
            out_specs=pl.BlockSpec((eff_tile, N_pad), lambda i: (i, 0)),
        ),
        compiler_params=pltpu.CompilerParams(
            dimension_semantics=("parallel",)),   # batch shards across TCs on v7x
        cost_estimate=pl.CostEstimate(
            flops=int(flops), transcendentals=0, bytes_accessed=int(bytes_accessed)),
    )(x, *resident)

    # Pure layout plumbing: keep the store lane-dense, slice the 10 real logits.
    return out_p[:, :OUT_FEATURES]


def init_params(key, hidden_size=32):
    """Deterministic init mimicking nn.Linear's U(-1/sqrt(fan_in), 1/sqrt(fan_in)).
    Weights stored transposed: (in_features, out_features)."""
    dims = [(IN_FEATURES, hidden_size), (hidden_size, hidden_size), (hidden_size, 10)]
    params = []
    for (fan_in, fan_out) in dims:
        key, kw, kb = jax.random.split(key, 3)
        bound = 1.0 / jnp.sqrt(jnp.float32(fan_in))
        w = jax.random.uniform(kw, (fan_in, fan_out), jnp.float32, -bound, bound)
        b = jax.random.uniform(kb, (1, fan_out), jnp.float32, -bound, bound)
        params.extend([w, b])
    return params


if __name__ == "__main__":
    key = jax.random.PRNGKey(0)
    hidden_size = 32          # small hidden size for the synthetic test
    batch = 64                # small, but enough for a 2-step (megacore) grid

    key, kx = jax.random.split(key)
    # MNIST-like input: (B, 1, 28, 28); forward flattens to (B, 784).
    x_img = jax.random.normal(kx, (batch, 1, 28, 28), jnp.float32)

    w1, b1, w2, b2, w3, b3 = init_params(key, hidden_size)

    out = mlp_forward(x_img, w1, b1, w2, b2, w3, b3)
    out = jax.block_until_ready(out)
    assert out.shape == (batch, 10)

    x = x_img.reshape(-1, IN_FEATURES)

    # Reference with matching bf16 operands / f32 accumulation (tight tolerance).
    bf = jnp.bfloat16
    r = jnp.maximum(jnp.dot(x.astype(bf), w1.astype(bf),
                            preferred_element_type=jnp.float32) + b1, 0.0)
    r = jnp.maximum(jnp.dot(r.astype(bf), w2.astype(bf),
                            preferred_element_type=jnp.float32) + b2, 0.0)
    ref_bf16 = jnp.dot(r.astype(bf), w3.astype(bf),
                       preferred_element_type=jnp.float32) + b3
    assert jnp.allclose(out, ref_bf16, atol=2e-3, rtol=2e-3)

    # Full-f32 reference sanity check (loose tolerance for the bf16 operands).
    ref = jnp.maximum(x @ w1 + b1, 0.0)
    ref = jnp.maximum(ref @ w2 + b2, 0.0)
    ref = ref @ w3 + b3
    assert jnp.allclose(out, ref, atol=5e-2, rtol=5e-2)

    # Ragged batch (not a multiple of the tile): exercises the masked last block
    # path that replaces the old wrapper-side batch padding.
    out_r = jax.block_until_ready(mlp_forward(x_img[:40], w1, b1, w2, b2, w3, b3))
    assert out_r.shape == (40, 10)
    assert jnp.allclose(out_r, ref_bf16[:40], atol=2e-3, rtol=2e-3)

    print("KERNEL_OK")
</pallas_src>

<mosaic_0001>
module attributes {stable_mosaic.version = 11 : i64} {
  func.func @mlp_kernel(%arg0: i32, %arg1: memref<32x784xf32, #tpu.memory_space<vmem>>, %arg2: memref<784x128xbf16, #tpu.memory_space<vmem>>, %arg3: memref<1x128xf32, #tpu.memory_space<vmem>>, %arg4: memref<128x128xbf16, #tpu.memory_space<vmem>>, %arg5: memref<1x128xf32, #tpu.memory_space<vmem>>, %arg6: memref<128x128xbf16, #tpu.memory_space<vmem>>, %arg7: memref<1x128xf32, #tpu.memory_space<vmem>>, %arg8: memref<32x128xf32, #tpu.memory_space<vmem>>) attributes {dimension_semantics = [#tpu.dimension_semantics<parallel>], iteration_bounds = array<i64: 2>, scalar_prefetch = 0 : i64, scratch_operands = 0 : i64, tpu.core_type = #tpu.core_type<tc>, window_params = [{transform_indices = @transform_0, window_bounds = array<i64: 32, 784>}, {pipeline_mode = #tpu.pipeline_mode<synchronous>, transform_indices = @transform_1, window_bounds = array<i64: 784, 128>}, {pipeline_mode = #tpu.pipeline_mode<synchronous>, transform_indices = @transform_2, window_bounds = array<i64: 1, 128>}, {pipeline_mode = #tpu.pipeline_mode<synchronous>, transform_indices = @transform_3, window_bounds = array<i64: 128, 128>}, {pipeline_mode = #tpu.pipeline_mode<synchronous>, transform_indices = @transform_4, window_bounds = array<i64: 1, 128>}, {pipeline_mode = #tpu.pipeline_mode<synchronous>, transform_indices = @transform_5, window_bounds = array<i64: 128, 128>}, {pipeline_mode = #tpu.pipeline_mode<synchronous>, transform_indices = @transform_6, window_bounds = array<i64: 1, 128>}, {transform_indices = @transform_7, window_bounds = array<i64: 32, 128>}]} {
    %c0 = arith.constant 0 : index
    %c0_0 = arith.constant 0 : index
    %0 = vector.load %arg1[%c0, %c0_0] : memref<32x784xf32, #tpu.memory_space<vmem>>, vector<32x784xf32>
    %1 = arith.truncf %0 : vector<32x784xf32> to vector<32x784xbf16>
    %c0_1 = arith.constant 0 : index
    %c0_2 = arith.constant 0 : index
    %2 = vector.load %arg2[%c0_1, %c0_2] : memref<784x128xbf16, #tpu.memory_space<vmem>>, vector<784x128xbf16>
    %cst = arith.constant dense<0.000000e+00> : vector<32x128xf32>
    %3 = tpu.matmul %1, %2, %cst {dimension_numbers = #tpu.dot_dimension_numbers<[1], [0], [0], [1], [0, 0, 1, 1], [], []>} : vector<32x784xbf16>, vector<784x128xbf16>, vector<32x128xf32> -> vector<32x128xf32>
    %c0_3 = arith.constant 0 : index
    %c0_4 = arith.constant 0 : index
    %4 = vector.load %arg3[%c0_3, %c0_4] : memref<1x128xf32, #tpu.memory_space<vmem>>, vector<1x128xf32>
    %5 = vector.broadcast %4 : vector<1x128xf32> to vector<32x128xf32>
    %6 = arith.addf %3, %5 : vector<32x128xf32>
    %cst_5 = arith.constant 0.000000e+00 : f32
    %7 = vector.broadcast %cst_5 : f32 to vector<32x128xf32>
    %8 = arith.maximumf %6, %7 : vector<32x128xf32>
    %9 = arith.truncf %8 : vector<32x128xf32> to vector<32x128xbf16>
    %c0_6 = arith.constant 0 : index
    %c0_7 = arith.constant 0 : index
    %10 = vector.load %arg4[%c0_6, %c0_7] : memref<128x128xbf16, #tpu.memory_space<vmem>>, vector<128x128xbf16>
    %cst_8 = arith.constant dense<0.000000e+00> : vector<32x128xf32>
    %11 = tpu.matmul %9, %10, %cst_8 {dimension_numbers = #tpu.dot_dimension_numbers<[1], [0], [0], [1], [0, 0, 1, 1], [], []>} : vector<32x128xbf16>, vector<128x128xbf16>, vector<32x128xf32> -> vector<32x128xf32>
    %c0_9 = arith.constant 0 : index
    %c0_10 = arith.constant 0 : index
    %12 = vector.load %arg5[%c0_9, %c0_10] : memref<1x128xf32, #tpu.memory_space<vmem>>, vector<1x128xf32>
    %13 = vector.broadcast %12 : vector<1x128xf32> to vector<32x128xf32>
    %14 = arith.addf %11, %13 : vector<32x128xf32>
    %cst_11 = arith.constant 0.000000e+00 : f32
    %15 = vector.broadcast %cst_11 : f32 to vector<32x128xf32>
    %16 = arith.maximumf %14, %15 : vector<32x128xf32>
    %17 = arith.truncf %16 : vector<32x128xf32> to vector<32x128xbf16>
    %c0_12 = arith.constant 0 : index
    %c0_13 = arith.constant 0 : index
    %18 = vector.load %arg6[%c0_12, %c0_13] : memref<128x128xbf16, #tpu.memory_space<vmem>>, vector<128x128xbf16>
    %cst_14 = arith.constant dense<0.000000e+00> : vector<32x128xf32>
    %19 = tpu.matmul %17, %18, %cst_14 {dimension_numbers = #tpu.dot_dimension_numbers<[1], [0], [0], [1], [0, 0, 1, 1], [], []>} : vector<32x128xbf16>, vector<128x128xbf16>, vector<32x128xf32> -> vector<32x128xf32>
    %c0_15 = arith.constant 0 : index
    %c0_16 = arith.constant 0 : index
    %20 = vector.load %arg7[%c0_15, %c0_16] : memref<1x128xf32, #tpu.memory_space<vmem>>, vector<1x128xf32>
    %21 = vector.broadcast %20 : vector<1x128xf32> to vector<32x128xf32>
    %22 = arith.addf %19, %21 : vector<32x128xf32>
    %c0_17 = arith.constant 0 : index
    %c0_18 = arith.constant 0 : index
    %23 = vector.load %arg8[%c0_17, %c0_18] : memref<32x128xf32, #tpu.memory_space<vmem>>, vector<32x128xf32>
    tpu.vector_store %arg8[%c0_17, %c0_18], %22 {strides = array<i32>} : memref<32x128xf32, #tpu.memory_space<vmem>>, vector<32x128xf32>,
    return
  }
  func.func @transform_0(%arg0: i32) -> (i32, i32) {
    %c0_i32 = arith.constant 0 : i32
    %c0_i32_0 = arith.constant 0 : i32
    return %arg0, %c0_i32 : i32, i32
  }
  func.func @transform_1(%arg0: i32) -> (i32, i32) {
    %c0_i32 = arith.constant 0 : i32
    %c0_i32_0 = arith.constant 0 : i32
    %c0_i32_1 = arith.constant 0 : i32
    return %c0_i32, %c0_i32_0 : i32, i32
  }
  func.func @transform_2(%arg0: i32) -> (i32, i32) {
    %c0_i32 = arith.constant 0 : i32
    %c0_i32_0 = arith.constant 0 : i32
    %c0_i32_1 = arith.constant 0 : i32
    return %c0_i32, %c0_i32_0 : i32, i32
  }
  func.func @transform_3(%arg0: i32) -> (i32, i32) {
    %c0_i32 = arith.constant 0 : i32
    %c0_i32_0 = arith.constant 0 : i32
    %c0_i32_1 = arith.constant 0 : i32
    return %c0_i32, %c0_i32_0 : i32, i32
  }
  func.func @transform_4(%arg0: i32) -> (i32, i32) {
    %c0_i32 = arith.constant 0 : i32
    %c0_i32_0 = arith.constant 0 : i32
    %c0_i32_1 = arith.constant 0 : i32
    return %c0_i32, %c0_i32_0 : i32, i32
  }
  func.func @transform_5(%arg0: i32) -> (i32, i32) {
    %c0_i32 = arith.constant 0 : i32
    %c0_i32_0 = arith.constant 0 : i32
    %c0_i32_1 = arith.constant 0 : i32
    return %c0_i32, %c0_i32_0 : i32, i32
  }
  func.func @transform_6(%arg0: i32) -> (i32, i32) {
    %c0_i32 = arith.constant 0 : i32
    %c0_i32_0 = arith.constant 0 : i32
    %c0_i32_1 = arith.constant 0 : i32
    return %c0_i32, %c0_i32_0 : i32, i32
  }
  func.func @transform_7(%arg0: i32) -> (i32, i32) {
    %c0_i32 = arith.constant 0 : i32
    %c0_i32_0 = arith.constant 0 : i32
    return %arg0, %c0_i32 : i32, i32
  }
}

</mosaic_0001>

<bundles_post_ra>
// kernel: mlp_forward.1
= control target key start
LH: loop header
LB: loop body
LE: loop exit
PB: predicated region body
PF: predicated region fallthrough
CT: control target
= control target key end

     0   :  { %s1516_s24 = smov 0   ;;  %s1771_s0 = inlined_call_operand.vmem [shape: f32[64,784], index: 0, kind: input, shape index: {}]   ;;  %s1772_s1 = inlined_call_operand.vmem [shape: bf16[784,128], index: 1, kind: input, shape index: {}]   ;;  %s1773_s2 = inlined_call_operand.vmem [shape: f32[1,128], index: 2, kind: input, shape index: {}]   ;;  %s1774_s3 = inlined_call_operand.vmem [shape: bf16[128,128], index: 3, kind: input, shape index: {}]   ;;  %s1775_s4 = inlined_call_operand.vmem [shape: f32[1,128], index: 4, kind: input, shape index: {}]   ;;  %s1776_s5 = inlined_call_operand.vmem [shape: bf16[128,128], index: 5, kind: input, shape index: {}]   ;;  %s1777_s6 = inlined_call_operand.vmem [shape: f32[1,128], index: 6, kind: input, shape index: {}]   ;;  %s1778_s7 = inlined_call_operand.vmem [shape: f32[64,128], index: 7, kind: output, shape index: {}]  }
   0x1 LB: > { %s1110_s25 = sadd.s32 4294967295, %s1474_s24   ;;  %p1114_p0 = scmp.ge.s32.totalorder %s1474_s24, 1  ;;  %s1474_s24 = sphi %s1516_s24, %s17_s24  }
   0x2   : > { %p239_p1 = scmp.lt.s32.totalorder %s1474_s24, 3 }
   0x4   : > { %p240_p2 = pnand %p1114_p0, %p239_p1 }
   0x5   : > { %s1115_s29 = sshll.u32 (!%p240_p2), %s1110_s25, 2 }
   0x6   : > { %243 = sbr.rel (%p240_p2) target bundleno = 522 (0x20a), region = 48  ;;  %p273_p3 = scmp.lt.s32.totalorder (!%p240_p2), %s1115_s29, 7 }
   0xb   : > { %v1390_v0 = vld [vmem:[%s1772_s1 + $0x38] sm:$0xff]  ;;  %v1389_v4 = vld [vmem:[%s1772_s1 + $0x30] sm:$0xff]  ;;  %v1388_v8 = vld [vmem:[%s1772_s1 + $0x28] sm:$0xff]  ;;  %s1780_s29 = smov (!%p273_p3, %s1115_s29), 7  ;;  %vm724_vm0 = vcmask 130048  }
   0xc   : > { %v1398_v1 = vld [vmem:[%s1772_s1 + $0x78] sm:$0xff]  ;;  %731 = vmatpush.bf16.msra.mxu0 %v1390_v0  ;;  %v1397_v5 = vld [vmem:[%s1772_s1 + $0x70] sm:$0xff]  ;;  %v1396_v9 = vld [vmem:[%s1772_s1 + $0x68] sm:$0xff]  ;;  %s1456_s28 = smul.u32 56, %s1780_s29  ;;  %s1118_s17 = sshll.u32 %s1780_s29, 3 }
   0xd   : > { %v1406_v2 = vld [vmem:[%s1772_s1 + $0xb8] sm:$0xff]  ;;  %750 = vmatpush.bf16.msra.mxu1 %v1398_v1  ;;  %v1405_v6 = vld [vmem:[%s1772_s1 + $0xb0] sm:$0xff]  ;;  %v1404_v10 = vld [vmem:[%s1772_s1 + $0xa8] sm:$0xff]  ;;  %s283_s22 = scalar_lea.vmem %s1778_s7, %s1118_s17 }
   0xe   : > { %v1414_v3 = vld [vmem:[%s1772_s1 + $0xf8] sm:$0xff]  ;;  %769 = vmatpush.bf16.msra.mxu2 %v1406_v2  ;;  %v1413_v7 = vld [vmem:[%s1772_s1 + $0xf0] sm:$0xff]  ;;  %v1412_v11 = vld [vmem:[%s1772_s1 + $0xe8] sm:$0xff]  ;;  %s1608_s16 = scalar_lea.vmem %s1771_s0, %s1456_s28 }
   0xf   : > { %788 = vmatpush.bf16.msra.mxu3 %v1414_v3  ;;  %v1387_v12 = vld [vmem:[%s1772_s1 + $0x20] sm:$0xff]  ;;  %v1386_v16 = vld [vmem:[%s1772_s1 + $0x18] sm:$0xff]  ;;  %v1385_v20 = vld [vmem:[%s1772_s1 + $0x10] sm:$0xff] }
  0x10   : > { %732 = vmatpush.bf16.msra.mxu0 %v1389_v4  ;;  %v1395_v13 = vld [vmem:[%s1772_s1 + $0x60] sm:$0xff]  ;;  %v1394_v17 = vld [vmem:[%s1772_s1 + $0x58] sm:$0xff]  ;;  %v1393_v21 = vld [vmem:[%s1772_s1 + $0x50] sm:$0xff] }
  0x11   : > { %751 = vmatpush.bf16.msra.mxu1 %v1397_v5  ;;  %v1403_v14 = vld [vmem:[%s1772_s1 + $0xa0] sm:$0xff]  ;;  %v1402_v18 = vld [vmem:[%s1772_s1 + $0x98] sm:$0xff]  ;;  %v1401_v22 = vld [vmem:[%s1772_s1 + $0x90] sm:$0xff] }
  0x12   : > { %770 = vmatpush.bf16.msra.mxu2 %v1405_v6  ;;  %v1411_v15 = vld [vmem:[%s1772_s1 + $0xe0] sm:$0xff]  ;;  %v1410_v19 = vld [vmem:[%s1772_s1 + $0xd8] sm:$0xff]  ;;  %v1409_v23 = vld [vmem:[%s1772_s1 + $0xd0] sm:$0xff] }
  0x13   : > { %789 = vmatpush.bf16.msra.mxu3 %v1413_v7  ;;  %v1384_v24 = vld [vmem:[%s1772_s1 + $0x8] sm:$0xff]  ;;  %v1383_v28 = vld [vmem:[%s1772_s1] sm:$0xff]  ;;  %v293_v33 = vld [vmem:[%s1608_s16 + $0x38] sm:$0xff] }
  0x14   : > { %733 = vmatpush.bf16.msra.mxu0 %v1388_v8  ;;  %v1392_v25 = vld [vmem:[%s1772_s1 + $0x48] sm:$0xff]  ;;  %v1391_v29 = vld [vmem:[%s1772_s1 + $0x40] sm:$0xff]  ;;  %v288_v36 = vld [vmem:[%s1608_s16 + $0x10] sm:$0xff] }
  0x15   : > { %752 = vmatpush.bf16.msra.mxu1 %v1396_v9  ;;  %v1400_v26 = vld [vmem:[%s1772_s1 + $0x88] sm:$0xff]  ;;  %v1399_v30 = vld [vmem:[%s1772_s1 + $0x80] sm:$0xff]  ;;  %v1422_v39 = vld [vmem:[%s1772_s1 + $0x138] sm:$0xff] }
  0x16   : > { %771 = vmatpush.bf16.msra.mxu2 %v1404_v10  ;;  %v1408_v27 = vld [vmem:[%s1772_s1 + $0xc8] sm:$0xff]  ;;  %v1407_v31 = vld [vmem:[%s1772_s1 + $0xc0] sm:$0xff]  ;;  %v289_v40 = vld [vmem:[%s1608_s16 + $0x18] sm:$0xff] }
  0x17   : > { %790 = vmatpush.bf16.msra.mxu3 %v1412_v11  ;;  %v286_v32 = vld [vmem:[%s1608_s16] sm:$0xff]  ;;  %v287_v34 = vld [vmem:[%s1608_s16 + $0x8] sm:$0xff]  ;;  %v296_v41 = vld [vmem:[%s1608_s16 + $0x50] sm:$0xff] }
  0x18   : > { %734 = vmatpush.bf16.msra.mxu0 %v1387_v12  ;;  %v294_v35 = vld [vmem:[%s1608_s16 + $0x40] sm:$0xff]  ;;  %v295_v37 = vld [vmem:[%s1608_s16 + $0x48] sm:$0xff]  ;;  %v314_v42 = vpack.c.bf16 %v293_v33, %v286_v32  ;;  %v1430_v45 = vld [vmem:[%s1772_s1 + $0x178] sm:$0xff]  ;;  %v317_v46 = vpack.c.bf16 %v296_v41, %v289_v40 }
  0x19   : > { %753 = vmatpush.bf16.msra.mxu1 %v1395_v13  ;;  %v1431_v38 = vld [vmem:[%s1772_s1 + $0x180] sm:$0xff]  ;;  %v315_v43 = vpack.c.bf16 %v294_v35, %v287_v34  ;;  %v316_v44 = vpack.c.bf16 %v295_v37, %v288_v36  ;;  %v1421_v47 = vld [vmem:[%s1772_s1 + $0x130] sm:$0xff]  ;;  %v1420_v49 = vld [vmem:[%s1772_s1 + $0x128] sm:$0xff] }
  0x1a   : > { %772 = vmatpush.bf16.msra.mxu2 %v1403_v14  ;;  %v1429_v48 = vld [vmem:[%s1772_s1 + $0x170] sm:$0xff]  ;;  %v1428_v50 = vld [vmem:[%s1772_s1 + $0x168] sm:$0xff]  ;;  %v1419_v51 = vld [vmem:[%s1772_s1 + $0x120] sm:$0xff] }
  0x1b   : > { %791 = vmatpush.bf16.msra.mxu3 %v1411_v15  ;;  %v1427_v52 = vld [vmem:[%s1772_s1 + $0x160] sm:$0xff]  ;;  %v300_v53 = vld [vmem:[%s1608_s16 + $0x70] sm:$0xff]  ;;  %v307_v54 = vld [vmem:[%s1608_s16 + $0xa8] sm:$0xff] }
  0x1c   : > { %735 = vmatpush.bf16.msra.mxu0 %v1386_v16  ;;  %v301_v55 = vld [vmem:[%s1608_s16 + $0x78] sm:$0xff]  ;;  %v308_v56 = vld [vmem:[%s1608_s16 + $0xb0] sm:$0xff]  ;;  %v302_v57 = vld [vmem:[%s1608_s16 + $0x80] sm:$0xff]  ;;  %v321_v62 = vpack.c.bf16 %v307_v54, %v300_v53 }
  0x1d   : > { %754 = vmatpush.bf16.msra.mxu1 %v1394_v17  ;;  %v309_v58 = vld [vmem:[%s1608_s16 + $0xb8] sm:$0xff]  ;;  %v303_v60 = vld [vmem:[%s1608_s16 + $0x88] sm:$0xff]  ;;  %v310_v61 = vld [vmem:[%s1608_s16 + $0xc0] sm:$0xff]  ;;  %v322_v63 = vpack.c.bf16 %v308_v56, %v301_v55 }
  0x1e   : > { %773 = vmatpush.bf16.msra.mxu2 %v1402_v18  ;;  %v1418_v59 = vld [vmem:[%s1772_s1 + $0x118] sm:$0xff]  ;;  %v323_v0 = vpack.c.bf16 %v309_v58, %v302_v57  ;;  %v324_v2 = vpack.c.bf16 %v310_v61, %v303_v60  ;;  %v1417_v3 = vld [vmem:[%s1772_s1 + $0x110] sm:$0xff]  ;;  %v1416_v5 = vld [vmem:[%s1772_s1 + $0x108] sm:$0xff] }
  0x1f   : > { %792 = vmatpush.bf16.msra.mxu3 %v1410_v19  ;;  %v1426_v1 = vld [vmem:[%s1772_s1 + $0x158] sm:$0xff]  ;;  %v1425_v4 = vld [vmem:[%s1772_s1 + $0x150] sm:$0xff]  ;;  %v1424_v6 = vld [vmem:[%s1772_s1 + $0x148] sm:$0xff] }
  0x20   : > { %736 = vmatpush.bf16.msra.mxu0 %v1385_v20  ;;  %v1415_v7 = vld [vmem:[%s1772_s1 + $0x100] sm:$0xff]  ;;  %v297_v10 = vld [vmem:[%s1608_s16 + $0x58] sm:$0xff]  ;;  %v291_v11 = vld [vmem:[%s1608_s16 + $0x28] sm:$0xff] }
  0x21   : > { %755 = vmatpush.bf16.msra.mxu1 %v1393_v21  ;;  %v1423_v8 = vld [vmem:[%s1772_s1 + $0x140] sm:$0xff]  ;;  %v292_v13 = vld [vmem:[%s1608_s16 + $0x30] sm:$0xff]  ;;  %v299_v14 = vld [vmem:[%s1608_s16 + $0x68] sm:$0xff] }
  0x22   : > { %774 = vmatpush.bf16.msra.mxu2 %v1401_v22  ;;  %v290_v9 = vld [vmem:[%s1608_s16 + $0x20] sm:$0xff]  ;;  %v320_v17 = vpack.c.bf16 %v299_v14, %v292_v13  ;;  %v304_v18 = vld [vmem:[%s1608_s16 + $0x90] sm:$0xff]  ;;  %v311_v19 = vld [vmem:[%s1608_s16 + $0xc8] sm:$0xff] }
  0x23   : > { %793 = vmatpush.bf16.msra.mxu3 %v1409_v23  ;;  %v298_v12 = vld [vmem:[%s1608_s16 + $0x60] sm:$0xff]  ;;  %v318_v15 = vpack.c.bf16 %v297_v10, %v290_v9  ;;  %v305_v20 = vld [vmem:[%s1608_s16 + $0x98] sm:$0xff]  ;;  %v312_v21 = vld [vmem:[%s1608_s16 + $0xd0] sm:$0xff] }
  0x24   : > { %737 = vmatpush.bf16.msra.mxu0 %v1384_v24  ;;  %v319_v16 = vpack.c.bf16 %v298_v12, %v291_v11  ;;  %v306_v22 = vld [vmem:[%s1608_s16 + $0xa0] sm:$0xff]  ;;  %v313_v23 = vld [vmem:[%s1608_s16 + $0xd8] sm:$0xff]  ;;  %v325_v24 = vpack.c.bf16 %v311_v19, %v304_v18  ;;  %v1434_v37 = vld [vmem:[%s1774_s3 + $0x10] sm:$0xff] }
  0x25   : > { %756 = vmatpush.bf16.msra.mxu1 %v1392_v25  ;;  %v326_v25 = vpack.c.bf16 %v312_v21, %v305_v20  ;;  %v1436_v32 = vld [vmem:[%s1774_s3 + $0x20] sm:$0xff]  ;;  %v1435_v33 = vld [vmem:[%s1774_s3 + $0x18] sm:$0xff] }
  0x26   : > { %775 = vmatpush.bf16.msra.mxu2 %v1400_v26  ;;  %v327_v26 = vpack.c.bf16 %v313_v23, %v306_v22  ;;  %v1444_v14 = vld [vmem:[%s1776_s5 + $0x20] sm:$0xff] }
  0x27   : > { %794 = vmatpush.bf16.msra.mxu3 %v1408_v27  ;;  %v1439_v27 = vld [vmem:[%s1774_s3 + $0x38] sm:$0xff] }
  0x28   : > { %738 = vmatpush.bf16.msra.mxu0 %v1383_v28  ;;  %v1438_v28 = vld [vmem:[%s1774_s3 + $0x30] sm:$0xff] }
  0x29   : > { %757 = vmatpush.bf16.msra.mxu1 %v1391_v29  ;;  %v1437_v29 = vld [vmem:[%s1774_s3 + $0x28] sm:$0xff] }
  0x2a   : > { %776 = vmatpush.bf16.msra.mxu2 %v1399_v30 }
  0x2b   : > { %795 = vmatpush.bf16.msra.mxu3 %v1407_v31  ;;  %739 = vmatmul.bf16.vlgmr.msra.gmra.mxu0 %v314_v42  ;;  %v1432_v42 = vld [vmem:[%s1774_s3] sm:$0xff] }
  0x2c   : > { %807 = vmatpush.bf16.msrb.mxu0 %v1422_v39  ;;  %758 = vmatmul.bf16.vlgmr.msra.gmra.mxu1 %v315_v43  ;;  %v1465_v43 = vld [vmem:[%s1773_s2] ss:$0 sm:$0xff] }
  0x2d   : > { %777 = vmatmul.bf16.vlgmr.msra.gmra.mxu2 %v316_v44  ;;  %826 = vmatpush.bf16.msrb.mxu1 %v1430_v45 }
  0x2e   : > { %852 = vmatpush.bf16.msrb.mxu2 %v1431_v38  ;;  %796 = vmatmul.bf16.vlgmr.msra.gmra.mxu3 %v317_v46  ;;  %v1433_v38 = vld [vmem:[%s1774_s3 + $0x8] sm:$0xff] }
  0x2f   : > { %938 = vmatpush.bf16.msrb.mxu3 %v1439_v27 }
  0x30   : > { %808 = vmatpush.bf16.msrb.mxu0 %v1421_v47 }
  0x31   : > { %827 = vmatpush.bf16.msrb.mxu1 %v1429_v48 }
  0x33   : > { %939 = vmatpush.bf16.msrb.mxu3 %v1438_v28 }
  0x34   : > { %809 = vmatpush.bf16.msrb.mxu0 %v1420_v49 }
  0x35   : > { %828 = vmatpush.bf16.msrb.mxu1 %v1428_v50 }
  0x37   : > { %940 = vmatpush.bf16.msrb.mxu3 %v1437_v29 }
  0x38   : > { %810 = vmatpush.bf16.msrb.mxu0 %v1419_v51 }
  0x39   : > { %829 = vmatpush.bf16.msrb.mxu1 %v1427_v52 }
  0x3b   : > { %744 = vmatmul.bf16.gmra.mxu0 %v321_v62  ;;  %941 = vmatpush.bf16.msrb.mxu3 %v1436_v32 }
  0x3c   : > { %811 = vmatpush.bf16.msrb.mxu0 %v1418_v59  ;;  %763 = vmatmul.bf16.gmra.mxu1 %v322_v63  ;;  %v1447_v59 = vld [vmem:[%s1776_s5 + $0x38] sm:$0xff] }
  0x3d   : > { %782 = vmatmul.bf16.gmra.mxu2 %v323_v0  ;;  %830 = vmatpush.bf16.msrb.mxu1 %v1426_v1  ;;  %v1446_v0 = vld [vmem:[%s1776_s5 + $0x30] sm:$0xff] }
  0x3e   : > { %801 = vmatmul.bf16.gmra.mxu3 %v324_v2 }
  0x3f   : > { %942 = vmatpush.bf16.msrb.mxu3 %v1435_v33 }
  0x40   : > { %812 = vmatpush.bf16.msrb.mxu0 %v1417_v3 }
  0x41   : > { %831 = vmatpush.bf16.msrb.mxu1 %v1425_v4 }
  0x43   : > { %943 = vmatpush.bf16.msrb.mxu3 %v1434_v37 }
  0x44   : > { %813 = vmatpush.bf16.msrb.mxu0 %v1416_v5 }
  0x45   : > { %832 = vmatpush.bf16.msrb.mxu1 %v1424_v6  ;;  %v1445_v6 = vld [vmem:[%s1776_s5 + $0x28] sm:$0xff] }
  0x47   : > { %944 = vmatpush.bf16.msrb.mxu3 %v1433_v38  ;;  %v1443_v38 = vld [vmem:[%s1776_s5 + $0x18] sm:$0xff] }
  0x48   : > { %814 = vmatpush.bf16.msrb.mxu0 %v1415_v7 }
  0x49   : > { %833 = vmatpush.bf16.msrb.mxu1 %v1423_v8 }
  0x4b   : > { %815 = vmatmul.bf16.vlgmr.msrb.gmra.mxu0 %v318_v15  ;;  %945 = vmatpush.bf16.msrb.mxu3 %v1432_v42 }
  0x4c   : > { %834 = vmatmul.bf16.vlgmr.msrb.gmra.mxu1 %v319_v16  ;;  %1031 = vmatpush.bf16.msra.mxu0 %v1447_v59 }
  0x4d   : > { %1315 = vmatmul.msk.bf16.vlgmr.msrb.gmra.mxu2 %vm724_vm0, %v320_v17  ;;  %1448 = vmatpush.bf16.msra.mxu1 %v1447_v59 }
  0x50   : > { %1032 = vmatpush.bf16.msra.mxu0 %v1446_v0 }
  0x51   : > { %1449 = vmatpush.bf16.msra.mxu1 %v1446_v0 }
  0x54   : > { %1033 = vmatpush.bf16.msra.mxu0 %v1445_v6 }
  0x55   : > { %1450 = vmatpush.bf16.msra.mxu1 %v1445_v6 }
  0x58   : > { %1034 = vmatpush.bf16.msra.mxu0 %v1444_v14 }
  0x59   : > { %1451 = vmatpush.bf16.msra.mxu1 %v1444_v14 }
  0x5b   : > { %820 = vmatmul.bf16.gmra.mxu0 %v325_v24 }
  0x5c   : > { %839 = vmatmul.bf16.gmra.mxu1 %v326_v25  ;;  %1035 = vmatpush.bf16.msra.mxu0 %v1443_v38 }
  0x5d   : > { %1316 = vmatmul.msk.bf16.gmra.mxu2 %vm724_vm0, %v327_v26  ;;  %1452 = vmatpush.bf16.msra.mxu1 %v1443_v38 }
  0xa8   : > { %v740_v30 = vpop.f32.mrf.mxu0 }
  0xa9   : > { %v759_v31 = vpop.f32.mrf.mxu1  ;;  %v741_v48 = vadd.f32 %v1465_v43, %v740_v30 }
  0xab   : > { %v760_v49 = vadd.f32 %v759_v31, %v741_v48 }
  0xb0   : > { %v778_v34 = vpop.f32.mrf.mxu2  ;;  %v742_v35 = vpop.f32.mrf.mxu0 }
  0xb1   : > { %v761_v36 = vpop.f32.mrf.mxu1  ;;  %v797_v44 = vpop.f32.mrf.mxu3  ;;  %v743_v50 = vadd.f32 %v1465_v43, %v742_v35  ;;  %v779_v55 = vadd.f32 %v778_v34, %v760_v49 }
  0xb3   : > { %v762_v56 = vadd.f32 %v761_v36, %v743_v50  ;;  %v798_v58 = vadd.f32 %v797_v44, %v779_v55 }
  0xb8   : > { %v780_v39 = vpop.f32.mrf.mxu2  ;;  %v745_v40 = vpop.f32.mrf.mxu0 }
  0xb9   : > { %v764_v41 = vpop.f32.mrf.mxu1  ;;  %v799_v54 = vpop.f32.mrf.mxu3  ;;  %v781_v57 = vadd.f32 %v780_v39, %v762_v56  ;;  %v746_v2 = vadd.f32 %v1465_v43, %v745_v40  ;;  %v1442_v39 = vld [vmem:[%s1776_s5 + $0x10] sm:$0xff]  ;;  %v1441_v40 = vld [vmem:[%s1776_s5 + $0x8] sm:$0xff] }
  0xba   : > { %1036 = vmatpush.bf16.msra.mxu0 %v1442_v39  ;;  %1453 = vmatpush.bf16.msra.mxu1 %v1442_v39 }
  0xbb   : > { %v800_v61 = vadd.f32 %v799_v54, %v781_v57  ;;  %v765_v7 = vadd.f32 %v764_v41, %v746_v2  ;;  %v1440_v41 = vld [vmem:[%s1776_s5] sm:$0xff] }
  0xbc   : > { %v1467_v57 = vld [vmem:[%s1777_s6] ss:$0 sm:$0xff] }
  0xbe   : > { %1037 = vmatpush.bf16.msra.mxu0 %v1441_v40  ;;  %1454 = vmatpush.bf16.msra.mxu1 %v1441_v40 }
  0xc0   : > { %v783_v45 = vpop.f32.mrf.mxu2  ;;  %v747_v46 = vpop.f32.mrf.mxu0 }
  0xc1   : > { %v766_v47 = vpop.f32.mrf.mxu1  ;;  %v802_v4 = vpop.f32.mrf.mxu3  ;;  %v748_v8 = vadd.f32 %v1465_v43, %v747_v46  ;;  %v784_v15 = vadd.f32 %v783_v45, %v765_v7  ;;  %v1466_v43 = vld [vmem:[%s1775_s4] ss:$0 sm:$0xff] }
  0xc2   : > { %1038 = vmatpush.bf16.msra.mxu0 %v1440_v41  ;;  %1455 = vmatpush.bf16.msra.mxu1 %v1440_v41 }
  0xc3   : > { %v767_v16 = vadd.f32 %v766_v47, %v748_v8  ;;  %v803_v23 = vadd.f32 %v802_v4, %v784_v15 }
  0xc8   : > { %v785_v51 = vpop.f32.mrf.mxu2  ;;  %v816_v52 = vpop.f32.mrf.mxu0 }
  0xc9   : > { %v835_v53 = vpop.f32.mrf.mxu1  ;;  %v817_v62 = vadd.f32 %v816_v52, %v798_v58  ;;  %v786_v20 = vadd.f32 %v785_v51, %v767_v16  ;;  %v804_v22 = vpop.f32.mrf.mxu3 }
  0xcb   : > { %v836_v5 = vadd.f32 %v835_v53, %v817_v62  ;;  %v805_v25 = vadd.f32 %v804_v22, %v786_v20 }
  0xd0   : > { %v854_v60 = vpop.f32.mrf.mxu2  ;;  %v818_v63 = vpop.f32.mrf.mxu0 }
  0xd1   : > { %v837_v1 = vpop.f32.mrf.mxu1  ;;  %v819_v3 = vadd.f32 %v818_v63, %v800_v61  ;;  %v855_v9 = vadd.f32 %v854_v60, %v836_v5 }
  0xd3   : > { %v838_v10 = vadd.f32 %v837_v1, %v819_v3  ;;  %v864_v17 = vmax.f32 %v855_v9, 0.0 }
  0xd8   : > { %v856_v11 = vpop.f32.mrf.mxu2  ;;  %v821_v13 = vpop.f32.mrf.mxu0 }
  0xd9   : > { %v857_v12 = vadd.f32 %v856_v11, %v838_v10  ;;  %v840_v19 = vpop.f32.mrf.mxu1  ;;  %v822_v26 = vadd.f32 %v821_v13, %v803_v23 }
  0xdb   : > { %v865_v18 = vmax.f32 %v857_v12, 0.0  ;;  %v841_v29 = vadd.f32 %v840_v19, %v822_v26 }
  0xdd   : > { %v868_v21 = vpack.c.bf16 %v865_v18, %v864_v17 }
  0xdf   : > { %946 = vmatmul.bf16.vlgmr.msrb.gmra.mxu3 %v868_v21 }
  0xe0   : > { %v859_v24 = vpop.f32.mrf.mxu2  ;;  %v823_v27 = vpop.f32.mrf.mxu0 }
  0xe1   : > { %v824_v28 = vadd.f32 %v823_v27, %v805_v25  ;;  %v842_v30 = vpop.f32.mrf.mxu1  ;;  %v860_v31 = vadd.f32 %v859_v24, %v841_v29 }
  0xe3   : > { %v843_v32 = vadd.f32 %v842_v30, %v824_v28  ;;  %v866_v35 = vmax.f32 %v860_v31, 0.0 }
  0xe8   : > { %v861_v33 = vpop.f32.mrf.mxu2 }
  0xe9   : > { %v862_v34 = vadd.f32 %v861_v33, %v843_v32 }
  0xeb   : > { %v867_v36 = vmax.f32 %v862_v34, 0.0 }
  0xed   : > { %v869_v37 = vpack.c.bf16 %v867_v36, %v866_v35 }
  0xef   : > { %951 = vmatmul.bf16.gmra.mxu3 %v869_v37 }
 0x162   : > { %v947_v42 = vpop.f32.mrf.mxu3 }
 0x163   : > { %v948_v44 = vadd.f32 %v1466_v43, %v947_v42 }
 0x165   : > { %v957_v47 = vmax.f32 %v948_v44, 0.0 }
 0x16a   : > { %v949_v45 = vpop.f32.mrf.mxu3 }
 0x16b   : > { %v950_v46 = vadd.f32 %v1466_v43, %v949_v45 }
 0x16d   : > { %v958_v48 = vmax.f32 %v950_v46, 0.0 }
 0x16f   : > { %v961_v49 = vpack.c.bf16 %v958_v48, %v957_v47 }
 0x171   : > { %1039 = vmatmul.bf16.vlgmr.msra.gmra.mxu0 %v961_v49 }
 0x172   : > { %v952_v50 = vpop.f32.mrf.mxu3 }
 0x173   : > { %v953_v51 = vadd.f32 %v1466_v43, %v952_v50 }
 0x175   : > { %v959_v54 = vmax.f32 %v953_v51, 0.0 }
 0x17a   : > { %v954_v52 = vpop.f32.mrf.mxu3 }
 0x17b   : > { %v955_v53 = vadd.f32 %v1466_v43, %v954_v52 }
 0x17d   : > { %v960_v55 = vmax.f32 %v955_v53, 0.0 }
 0x17f   : > { %v962_v56 = vpack.c.bf16 %v960_v55, %v959_v54 }
 0x181   : > { %1044 = vmatmul.bf16.vlgmr.msra.gmra.mxu1 %v962_v56 }
 0x1ee   : > { %v1040_v58 = vpop.f32.mrf.mxu0 }
 0x1ef   : > { %v1041_v59 = vadd.f32 %v1467_v57, %v1040_v58 }
 0x1f1   : > { %1050 = vst [vmem:[%s283_s22] sm:$0xff] %v1041_v59 }
 0x1f6   : > { %v1042_v60 = vpop.f32.mrf.mxu0 }
 0x1f7   : > { %v1043_v61 = vadd.f32 %v1467_v57, %v1042_v60 }
 0x1f9   : > { %1051 = vst [vmem:[%s283_s22 + $0x8] sm:$0xff] %v1043_v61 }
 0x1fe   : > { %v1045_v62 = vpop.f32.mrf.mxu1 }
 0x1ff   : > { %v1046_v63 = vadd.f32 %v1467_v57, %v1045_v62 }
 0x201   : > { %1052 = vst [vmem:[%s283_s22 + $0x10] sm:$0xff] %v1046_v63 }
 0x206   : > { %v1047_v0 = vpop.f32.mrf.mxu1 }
 0x207   : > { %v1048_v1 = vadd.f32 %v1467_v57, %v1047_v0 }
 0x209   : > { %1053 = vst [vmem:[%s283_s22 + $0x18] sm:$0xff] %v1048_v1 }
 0x20a PF: > { %s17_s24 = sadd.s32 1, %s1474_s24  }
 0x20b   : > { %p14_p4 = scmp.ge.s32.totalorder %s17_s24, 4  }
 0x20d   :  { %16 = sbr.rel (!%p14_p4) target bundleno = 1 (0x1), region = 78 }

</bundles_post_ra>
